<compile_context>
chip_gen: v7x
topology: tpu7x:2x2x1
jax: 0.10.0
libtpu: 0.0.40
codegen_flags: <defaults>
</compile_context>

<pallas_src>
import functools

import jax
import jax.numpy as jnp
from jax.experimental import pallas as pl
from jax.experimental.pallas import tpu as pltpu

HIDDEN = 100
HIDDEN_PAD = 128  # zero-pad hidden dim to the lane width


def lambda_i_kernel(t_ref, wb1_ref, w2_ref, c_ref, out_ref, *, is_isothermal):
    """One (.., TILE_N) slab in transposed (feature, N) layout.

    t_ref   : (1, TILE_N)             time fractions for this tile
    wb1_ref : (HIDDEN_PAD, 2)         col 0 = fc1 weight, col 1 = fc1 bias
    w2_ref  : (final_dim, HIDDEN_PAD) fc2 weight (out_features, in_features)
    c_ref   : (final_dim, 6)          cols: [b2, final_p, init_p, min_b, max_b, T]
    out_ref : (out_dim, TILE_N)       out_dim = 2 (row 0 = T in isothermal case)
    """
    t = t_ref[...]                                    # (1, TILE_N)
    w1 = wb1_ref[:, 0:1]                              # (128, 1)
    b1 = wb1_ref[:, 1:2]                              # (128, 1)
    # fc1 (in_features == 1) + ReLU, lane-dense over N.
    h = jnp.maximum(w1 * t + b1, 0.0)                 # (128, TILE_N)
    # fc2 on the MXU: lane-dense (final_dim, TILE_N) result.
    x = jnp.dot(w2_ref[...], h, preferred_element_type=jnp.float32)
    b2, fp, ip = c_ref[:, 0:1], c_ref[:, 1:2], c_ref[:, 2:3]
    minb, maxb = c_ref[:, 3:4], c_ref[:, 4:5]
    x = x + b2
    # protocol blend with boundary-vanishing correction, then clamp(|x|).
    x = fp * t + ip * (1.0 - t) + x * t * (t - 1.0)
    x = jnp.clip(jnp.abs(x), minb, maxb)
    if is_isothermal:
        out_ref[0:1, :] = jnp.broadcast_to(c_ref[0:1, 5:6], t.shape)  # constant T row
        out_ref[1:2, :] = x                                           # (1, TILE_N)
    else:
        out_ref[...] = x                                              # (2, TILE_N)


def make_lambda_i(is_isothermal_step, init_protocol, final_protocol, key,
                  tile_n=1024):
    """Builds deterministic params/buffers, returns (forward, forward_ref)."""
    init_protocol = jnp.asarray(init_protocol, jnp.float32)
    final_protocol = jnp.asarray(final_protocol, jnp.float32)

    if is_isothermal_step:
        assert float(init_protocol[0]) == float(final_protocol[0])
        T = init_protocol[0:1]
        ip = init_protocol[1:]
        fp = final_protocol[1:]
        final_dim = 1
    else:
        T = None
        ip = init_protocol
        fp = final_protocol
        final_dim = 2

    out_dim = 2  # isothermal case prepends the constant T column in-kernel

    minb = jnp.minimum(ip, fp)
    maxb = jnp.maximum(ip, fp)

    # Deterministic init mimicking nn.Linear defaults: U(-1/sqrt(fan_in), ...).
    k1, k2, k3, k4 = jax.random.split(key, 4)
    bound1 = 1.0  # fan_in = 1
    w1 = jax.random.uniform(k1, (1, HIDDEN), jnp.float32, -bound1, bound1)
    b1 = jax.random.uniform(k2, (HIDDEN,), jnp.float32, -bound1, bound1)
    bound2 = 1.0 / jnp.sqrt(float(HIDDEN))
    w2 = jax.random.uniform(k3, (HIDDEN, final_dim), jnp.float32, -bound2, bound2)
    b2 = jax.random.uniform(k4, (final_dim,), jnp.float32, -bound2, bound2)

    # --- pack kernel operands (transposed layout, hidden padded 100 -> 128) ---
    wb1 = jnp.zeros((HIDDEN_PAD, 2), jnp.float32)
    wb1 = wb1.at[:HIDDEN, 0].set(w1[0, :]).at[:HIDDEN, 1].set(b1)
    w2_p = jnp.zeros((final_dim, HIDDEN_PAD), jnp.float32).at[:, :HIDDEN].set(w2.T)
    t_col = T if is_isothermal_step else jnp.zeros((final_dim,), jnp.float32)
    t_col = jnp.broadcast_to(jnp.asarray(t_col, jnp.float32).reshape(-1), (final_dim,))
    consts = jnp.stack([b2, fp, ip, minb, maxb, t_col], axis=1)  # (final_dim, 6)

    kernel = functools.partial(lambda_i_kernel, is_isothermal=is_isothermal_step)

    @jax.jit
    def forward(t_frac):
        # NOTE: for tiny N (tens of rows) a plain-jnp path is cheaper than the
        # Pallas dispatch overhead; kept on the kernel path here so the demo
        # exercises the kernel.
        t_frac = jnp.asarray(t_frac, jnp.float32)
        N = t_frac.shape[0]
        n_pad = pl.cdiv(N, tile_n) * tile_n
        # Zero-pad and transpose so N lives on the lane axis.
        t_row = jnp.zeros((1, n_pad), jnp.float32).at[0, :N].set(t_frac[:, 0])

        flops = n_pad * (3 * HIDDEN_PAD + 2 * HIDDEN_PAD * final_dim + 10 * out_dim)
        bytes_accessed = 4 * (n_pad * (1 + out_dim)
                              + HIDDEN_PAD * 2 + final_dim * HIDDEN_PAD + final_dim * 6)

        out_t = pl.pallas_call(
            kernel,
            out_shape=jax.ShapeDtypeStruct((out_dim, n_pad), jnp.float32),
            grid=(n_pad // tile_n,),
            in_specs=[
                pl.BlockSpec((1, tile_n), lambda i: (0, i)),              # t tile
                pl.BlockSpec((HIDDEN_PAD, 2), lambda i: (0, 0)),          # fc1 w|b (resident)
                pl.BlockSpec((final_dim, HIDDEN_PAD), lambda i: (0, 0)),  # fc2 w  (resident)
                pl.BlockSpec((final_dim, 6), lambda i: (0, 0)),           # packed consts
            ],
            out_specs=pl.BlockSpec((out_dim, tile_n), lambda i: (0, i)),
            compiler_params=pltpu.CompilerParams(
                dimension_semantics=("parallel",)),
            cost_estimate=pl.CostEstimate(
                flops=flops, transcendentals=0, bytes_accessed=bytes_accessed),
        )(t_row, wb1, w2_p, consts)

        # (out_dim, n_pad) -> (N, out_dim); tail padding discarded.
        return out_t[:, :N].T

    # Pure-JAX reference for correctness checks.
    def forward_ref(t_frac):
        t_frac = jnp.asarray(t_frac, jnp.float32)
        h = jnp.maximum(t_frac @ w1 + b1, 0.0)
        x = h @ w2 + b2
        x = fp * t_frac + ip * (1.0 - t_frac) + x * t_frac * (t_frac - 1.0)
        x = jnp.clip(jnp.abs(x), minb, maxb)
        if is_isothermal_step:
            t_rep = jnp.broadcast_to(T.reshape(1, 1), x.shape)
            return jnp.concatenate([t_rep, x], axis=-1)
        return x

    return forward, forward_ref


if __name__ == "__main__":
    key = jax.random.PRNGKey(0)
    k_param, k_data = jax.random.split(key)

    # Case 1: non-isothermal step -> protocol = [T(t), k(t)], final_layer_dim = 2.
    # N = 8 time fractions, single 128-wide tile (rows 8..127 are inert padding).
    fwd, fwd_ref = make_lambda_i(
        is_isothermal_step=False,
        init_protocol=[0.1, 0.5],
        final_protocol=[0.9, 2.0],
        key=k_param,
        tile_n=128,
    )
    t8 = jax.random.uniform(k_data, (8, 1), jnp.float32)
    out = jax.block_until_ready(fwd(t8))
    ref = fwd_ref(t8)
    assert out.shape == (8, 2)
    assert jnp.allclose(out, ref, atol=1e-5, rtol=1e-5), (out, ref)

    # Case 2: isothermal step -> protocol = [T (fixed), k(t)].
    # N = 300 exercises the multi-tile grid (3 tiles of 128) + tail padding.
    fwd_iso, fwd_iso_ref = make_lambda_i(
        is_isothermal_step=True,
        init_protocol=[0.5, 0.1],
        final_protocol=[0.5, 1.0],
        key=k_param,
        tile_n=128,
    )
    t300 = jax.random.uniform(k_data, (300, 1), jnp.float32)
    out_iso = jax.block_until_ready(fwd_iso(t300))
    ref_iso = fwd_iso_ref(t300)
    assert out_iso.shape == (300, 2)
    assert jnp.allclose(out_iso, ref_iso, atol=1e-5, rtol=1e-5), (out_iso, ref_iso)

    print("KERNEL_OK")
</pallas_src>

<mosaic_0001>
module attributes {stable_mosaic.version = 11 : i64} {
  func.func @lambda_i_kernel(%arg0: i32, %arg1: memref<1x128xf32, #tpu.memory_space<vmem>>, %arg2: memref<128x2xf32, #tpu.memory_space<vmem>>, %arg3: memref<2x128xf32, #tpu.memory_space<vmem>>, %arg4: memref<2x6xf32, #tpu.memory_space<vmem>>, %arg5: memref<2x128xf32, #tpu.memory_space<vmem>>) attributes {dimension_semantics = [#tpu.dimension_semantics<parallel>], iteration_bounds = array<i64: 1>, scalar_prefetch = 0 : i64, scratch_operands = 0 : i64, tpu.core_type = #tpu.core_type<tc>, window_params = [{transform_indices = @transform_0, window_bounds = array<i64: 1, 128>}, {pipeline_mode = #tpu.pipeline_mode<synchronous>, transform_indices = @transform_1, window_bounds = array<i64: 128, 2>}, {pipeline_mode = #tpu.pipeline_mode<synchronous>, transform_indices = @transform_2, window_bounds = array<i64: 2, 128>}, {pipeline_mode = #tpu.pipeline_mode<synchronous>, transform_indices = @transform_3, window_bounds = array<i64: 2, 6>}, {transform_indices = @transform_4, window_bounds = array<i64: 2, 128>}]} {
    %c0 = arith.constant 0 : index
    %c0_0 = arith.constant 0 : index
    %0 = vector.load %arg1[%c0, %c0_0] : memref<1x128xf32, #tpu.memory_space<vmem>>, vector<1x128xf32>
    %c0_1 = arith.constant 0 : index
    %c0_2 = arith.constant 0 : index
    %1 = vector.load %arg2[%c0_1, %c0_2] : memref<128x2xf32, #tpu.memory_space<vmem>>, vector<128x1xf32>
    %c0_3 = arith.constant 0 : index
    %c1 = arith.constant 1 : index
    %2 = vector.load %arg2[%c0_3, %c1] : memref<128x2xf32, #tpu.memory_space<vmem>>, vector<128x1xf32>
    %3 = vector.broadcast %1 : vector<128x1xf32> to vector<128x128xf32>
    %4 = vector.broadcast %0 : vector<1x128xf32> to vector<128x128xf32>
    %5 = arith.mulf %3, %4 : vector<128x128xf32>
    %6 = vector.broadcast %2 : vector<128x1xf32> to vector<128x128xf32>
    %7 = arith.addf %5, %6 : vector<128x128xf32>
    %cst = arith.constant 0.000000e+00 : f32
    %8 = vector.broadcast %cst : f32 to vector<128x128xf32>
    %9 = arith.maximumf %7, %8 : vector<128x128xf32>
    %c0_4 = arith.constant 0 : index
    %c0_5 = arith.constant 0 : index
    %10 = vector.load %arg3[%c0_4, %c0_5] : memref<2x128xf32, #tpu.memory_space<vmem>>, vector<2x128xf32>
    %cst_6 = arith.constant dense<0.000000e+00> : vector<2x128xf32>
    %11 = tpu.matmul %10, %9, %cst_6 {dimension_numbers = #tpu.dot_dimension_numbers<[1], [0], [0], [1], [0, 0, 1, 1], [], []>} : vector<2x128xf32>, vector<128x128xf32>, vector<2x128xf32> -> vector<2x128xf32>
    %c0_7 = arith.constant 0 : index
    %c0_8 = arith.constant 0 : index
    %12 = vector.load %arg4[%c0_7, %c0_8] : memref<2x6xf32, #tpu.memory_space<vmem>>, vector<2x1xf32>
    %c0_9 = arith.constant 0 : index
    %c1_10 = arith.constant 1 : index
    %13 = vector.load %arg4[%c0_9, %c1_10] : memref<2x6xf32, #tpu.memory_space<vmem>>, vector<2x1xf32>
    %c0_11 = arith.constant 0 : index
    %c2 = arith.constant 2 : index
    %14 = vector.load %arg4[%c0_11, %c2] : memref<2x6xf32, #tpu.memory_space<vmem>>, vector<2x1xf32>
    %c0_12 = arith.constant 0 : index
    %c3 = arith.constant 3 : index
    %15 = vector.load %arg4[%c0_12, %c3] : memref<2x6xf32, #tpu.memory_space<vmem>>, vector<2x1xf32>
    %c0_13 = arith.constant 0 : index
    %c4 = arith.constant 4 : index
    %16 = vector.load %arg4[%c0_13, %c4] : memref<2x6xf32, #tpu.memory_space<vmem>>, vector<2x1xf32>
    %17 = vector.broadcast %12 : vector<2x1xf32> to vector<2x128xf32>
    %18 = arith.addf %11, %17 : vector<2x128xf32>
    %19 = vector.broadcast %13 : vector<2x1xf32> to vector<2x128xf32>
    %20 = vector.broadcast %0 : vector<1x128xf32> to vector<2x128xf32>
    %21 = arith.mulf %19, %20 : vector<2x128xf32>
    %cst_14 = arith.constant 1.000000e+00 : f32
    %22 = vector.broadcast %cst_14 : f32 to vector<1x128xf32>
    %23 = arith.subf %22, %0 : vector<1x128xf32>
    %24 = vector.broadcast %14 : vector<2x1xf32> to vector<2x128xf32>
    %25 = vector.broadcast %23 : vector<1x128xf32> to vector<2x128xf32>
    %26 = arith.mulf %24, %25 : vector<2x128xf32>
    %27 = arith.addf %21, %26 : vector<2x128xf32>
    %28 = vector.broadcast %0 : vector<1x128xf32> to vector<2x128xf32>
    %29 = arith.mulf %18, %28 : vector<2x128xf32>
    %cst_15 = arith.constant 1.000000e+00 : f32
    %30 = vector.broadcast %cst_15 : f32 to vector<1x128xf32>
    %31 = arith.subf %0, %30 : vector<1x128xf32>
    %32 = vector.broadcast %31 : vector<1x128xf32> to vector<2x128xf32>
    %33 = arith.mulf %29, %32 : vector<2x128xf32>
    %34 = arith.addf %27, %33 : vector<2x128xf32>
    %35 = math.absf %34 : vector<2x128xf32>
    %36 = vector.broadcast %15 : vector<2x1xf32> to vector<2x128xf32>
    %37 = arith.maximumf %36, %35 : vector<2x128xf32>
    %38 = vector.broadcast %16 : vector<2x1xf32> to vector<2x128xf32>
    %39 = arith.minimumf %38, %37 : vector<2x128xf32>
    %c0_16 = arith.constant 0 : index
    %c0_17 = arith.constant 0 : index
    %40 = vector.load %arg5[%c0_16, %c0_17] : memref<2x128xf32, #tpu.memory_space<vmem>>, vector<2x128xf32>
    tpu.vector_store %arg5[%c0_16, %c0_17], %39 {strides = array<i32>} : memref<2x128xf32, #tpu.memory_space<vmem>>, vector<2x128xf32>,
    return
  }
  func.func @transform_0(%arg0: i32) -> (i32, i32) {
    %c0_i32 = arith.constant 0 : i32
    %c0_i32_0 = arith.constant 0 : i32
    return %c0_i32, %arg0 : i32, i32
  }
  func.func @transform_1(%arg0: i32) -> (i32, i32) {
    %c0_i32 = arith.constant 0 : i32
    %c0_i32_0 = arith.constant 0 : i32
    %c0_i32_1 = arith.constant 0 : i32
    return %c0_i32, %c0_i32_0 : i32, i32
  }
  func.func @transform_2(%arg0: i32) -> (i32, i32) {
    %c0_i32 = arith.constant 0 : i32
    %c0_i32_0 = arith.constant 0 : i32
    %c0_i32_1 = arith.constant 0 : i32
    return %c0_i32, %c0_i32_0 : i32, i32
  }
  func.func @transform_3(%arg0: i32) -> (i32, i32) {
    %c0_i32 = arith.constant 0 : i32
    %c0_i32_0 = arith.constant 0 : i32
    %c0_i32_1 = arith.constant 0 : i32
    return %c0_i32, %c0_i32_0 : i32, i32
  }
  func.func @transform_4(%arg0: i32) -> (i32, i32) {
    %c0_i32 = arith.constant 0 : i32
    %c0_i32_0 = arith.constant 0 : i32
    return %c0_i32, %arg0 : i32, i32
  }
}

</mosaic_0001>

<bundles_post_ra>
// kernel: forward.1
= control target key start
LH: loop header
LB: loop body
LE: loop exit
PB: predicated region body
PF: predicated region fallthrough
CT: control target
= control target key end

     0   :  { %9 = vsyncpa [#allocation3], 0  ;;  %s503_s15 = smov [#allocation2]   ;;  %s614_s0 = inlined_call_operand.vmem [shape: f32[1,128], index: 0, kind: input, shape index: {}]   ;;  %s615_s1 = inlined_call_operand.hbm [shape: f32[128,2], index: 1, kind: input, shape index: {}]   ;;  %s616_s2 = inlined_call_operand.vmem [shape: f32[2,128], index: 2, kind: input, shape index: {}]   ;;  %s617_s3 = inlined_call_operand.vmem [shape: f32[2,6], index: 3, kind: input, shape index: {}]   ;;  %s618_s4 = inlined_call_operand.vmem [shape: f32[2,128], index: 4, kind: output, shape index: {}]  }
   0x1   :  { %s17_s16 = sshll.u32 %s503_s15, 4  ;;  %s479_s19 = scalar_lea.hbm %s615_s1, 2048  ;;  %s18_s16 = int_to_ptr.vmem [resolvable:$true] %s17_s16 }
   0x2   :  { %p480_p0 = scmp.ne.s32.totalorder %s615_s1, %s479_s19  ;;  %p483_p1 = scmp.lt.u32.totalorder %s479_s19, %s615_s1 }
   0x4   :  { %p485_p2 = pnand %p483_p1, %p480_p0 }
   0x6   :  { %488 = shalt.err (!%p485_p2)
}
   0x7   :  { %s489_s24 = scalar_lea.vmem %s18_s16, 2048  ;;  %p494_p4 = scmp.lt.s32.totalorder %s18_s16, %s18_s16 }
   0x8   :  { %p490_p3 = scmp.ne.s32.totalorder %s18_s16, %s489_s24  ;;  %p495_p5 = scmp.lt.s32.totalorder %s489_s24, %s489_s24 }
   0xa   :  { %p496_p6 = por %p495_p5, %p494_p4 }
   0xc   :  { %p497_p7 = pnand %p496_p6, %p490_p3 }
   0xe   :  { %500 = shalt.err (!%p497_p7)
}
   0xf   :  { %s504_s25 = smov 128   ;;  %s505_s26 = smov 8  }
  0x10   :  { %23 = dma.hbm_to_vmem [thread:$0]  %s615_s1, 2048, %s18_s16, [#allocation3], %s504_s25, %s504_s25, %s505_s26  }
  0x11   :  { %501 = dma.done.wait [#allocation3], 2048  }
  0x12   :  { %502 = vsyncadd [#allocation3], 4294965248  ;;  %v506_v0 = vmov 1   ;;  %v34_v1 = vld [vmem:[#allocation2 + $0x10] sm:$0xff]  ;;  %v32_v2 = vld [vmem:[#allocation2] sm:$0xff]  ;;  %v507_v7 = vmov 0   ;;  %v129_v26 = vlaneseq }
  0x13   :  { %458 = vset.pattern.permute.xlu0 %v506_v0  ;;  %456 = vset.pattern.permute.xlu1 %v506_v0  ;;  %v38_v3 = vld [vmem:[#allocation2 + $0x30] sm:$0xff]  ;;  %v33_v4 = vld [vmem:[#allocation2 + $0x8] sm:$0xff]  ;;  %v35_v6 = vld [vmem:[#allocation2 + $0x18] sm:$0xff]  ;;  %v508_v10 = vmov 0.0|0.0   ;;  %vm509_vm0 = vmmov 0   ;;  %v510_v20 = vmov 0.0  }
  0x14   :  { %159 = vperm.xlu0 %458, %v34_v1   ;;  %151 = vperm.xlu1 %456, %v32_v2   ;;  %v42_v5 = vld [vmem:[#allocation2 + $0x50] sm:$0xff]  ;;  %v36_v8 = vld [vmem:[#allocation2 + $0x20] sm:$0xff]  ;;  %v37_v9 = vld [vmem:[#allocation2 + $0x28] sm:$0xff]  ;;  %v511_v21 = vmov 2   ;;  %v512_v22 = vmov 3   ;;  %v513_v23 = vmov 4  }
  0x15   :  { %421 = vmatprep.subr.bf16.mxu0 %v508_v10  ;;  %v41_v11 = vld [vmem:[#allocation2 + $0x48] sm:$0xff]  ;;  %v39_v12 = vld [vmem:[#allocation2 + $0x38] sm:$0xff]  ;;  %v40_v14 = vld [vmem:[#allocation2 + $0x40] sm:$0xff]  ;;  %418 = vmatprep.mubr.msk.f32.mxu0 %vm509_vm0, %v510_v20  ;;  %v130_v29 = vshrl.u32 %v129_v26, 7 }
  0x16   :  { %v45_v13 = vld [vmem:[#allocation2 + $0x68] sm:$0xff]  ;;  %v46_v15 = vld [vmem:[#allocation2 + $0x70] sm:$0xff]  ;;  %v247_v16 = vld [vmem:[%s617_s3] sm:$0x3] }
  0x17   :  { %v43_v17 = vld [vmem:[#allocation2 + $0x58] sm:$0xff]  ;;  %v44_v18 = vld [vmem:[#allocation2 + $0x60] sm:$0xff]  ;;  %v567_v31 = vsub.s32 0, %v130_v29 }
  0x18   :  { %175 = vperm.xlu0 %458, %v38_v3   ;;  %155 = vperm.xlu1 %456, %v33_v4   ;;  %v47_v19 = vld [vmem:[#allocation2 + $0x78] sm:$0xff]  ;;  %v572_v33 = vld [vmem:[%s614_s0] sm:$0x1] }
  0x19   :  { %v576_v34 = vrot.slane %v572_v33, %v567_v31 }
  0x1c   :  { %191 = vperm.xlu0 %458, %v42_v5   ;;  %457 = vset.pattern.permute.xlu1 %v507_v7 }
  0x1d   :  { %65 = vperm.xlu1 %457, %v35_v6  }
  0x20   :  { %467 = vset.pattern.permute.xlu0 %v507_v7 }
  0x21   :  { %50 = vperm.xlu0 %467, %v32_v2   ;;  %459 = vset.pattern.permute.xlu1 %v506_v0 }
  0x22   :  { %163 = vperm.xlu1 %459, %v35_v6  }
  0x25   :  { %55 = vperm.xlu0 %467, %v33_v4  }
  0x26   :  { %460 = vset.pattern.permute.xlu1 %v507_v7 }
  0x27   :  { %70 = vperm.xlu1 %460, %v36_v8  }
  0x29   :  { %60 = vperm.xlu0 %467, %v34_v1  }
  0x2b   :  { %461 = vset.pattern.permute.xlu1 %v506_v0 }
  0x2c   :  { %167 = vperm.xlu1 %461, %v36_v8  }
  0x2d   :  { %75 = vperm.xlu0 %467, %v37_v9  }
  0x30   :  { %171 = vperm.xlu1 %461, %v37_v9  }
  0x31   :  { %80 = vperm.xlu0 %467, %v38_v3  }
  0x34   :  { %462 = vset.pattern.permute.xlu1 %v507_v7 }
  0x35   :  { %95 = vperm.xlu0 %467, %v41_v11   ;;  %85 = vperm.xlu1 %462, %v39_v12  }
  0x39   :  { %100 = vperm.xlu0 %467, %v42_v5   ;;  %463 = vset.pattern.permute.xlu1 %v506_v0 }
  0x3a   :  { %179 = vperm.xlu1 %463, %v39_v12  }
  0x3d   :  { %115 = vperm.xlu0 %467, %v45_v13  }
  0x3e   :  { %464 = vset.pattern.permute.xlu1 %v507_v7 }
  0x3f   :  { %90 = vperm.xlu1 %464, %v40_v14  }
  0x41   :  { %120 = vperm.xlu0 %467, %v46_v15  }
  0x43   :  { %465 = vset.pattern.permute.xlu1 %v506_v0 }
  0x44   :  { %183 = vperm.xlu1 %465, %v40_v14  }
  0x45   :  { %472 = vset.pattern.permute.xlu0 %v506_v0 }
  0x46   :  { %207 = vperm.xlu0 %472, %v46_v15  }
  0x48   :  { %187 = vperm.xlu1 %465, %v41_v11  }
  0x4a   :  { %324 = vperm.xlu0 %472, %v247_v16  }
  0x4c   :  { %466 = vset.pattern.permute.xlu1 %v507_v7 }
  0x4d   :  { %105 = vperm.xlu1 %466, %v43_v17  }
  0x4e   :  { %476 = vset.pattern.permute.xlu0 %v512_v22 }
  0x4f   :  { %353 = vperm.xlu0 %476, %v247_v16  }
  0x51   :  { %468 = vset.pattern.permute.xlu1 %v506_v0 }
  0x52   :  { %195 = vperm.xlu1 %468, %v43_v17  }
  0x53   :  { %478 = vset.pattern.permute.xlu0 %v513_v23 }
  0x56   :  { %469 = vset.pattern.permute.xlu1 %v507_v7 }
  0x57   :  { %110 = vperm.xlu1 %469, %v44_v18  }
  0x5b   :  { %470 = vset.pattern.permute.xlu1 %v506_v0 }
  0x5c   :  { %199 = vperm.xlu1 %470, %v44_v18  }
  0x60   :  { %203 = vperm.xlu1 %470, %v45_v13  }
  0x64   :  { %471 = vset.pattern.permute.xlu1 %v507_v7 }
  0x65   :  { %125 = vperm.xlu1 %471, %v47_v19  }
  0x69   :  { %473 = vset.pattern.permute.xlu1 %v506_v0 }
  0x6a   :  { %211 = vperm.xlu1 %473, %v47_v19  }
  0x6e   :  { %474 = vset.pattern.permute.xlu1 %v507_v7 }
  0x6f   :  { %250 = vperm.xlu1 %474, %v247_v16  }
  0x73   :  { %475 = vset.pattern.permute.xlu1 %v511_v21 }
  0x74   :  { %330 = vperm.xlu1 %475, %v247_v16  }
  0x78   :  { %477 = vset.pattern.permute.xlu1 %v513_v23 }
  0x79   :  { %358 = vperm.xlu1 %477, %v247_v16  }
  0x93   :  { %v152_v24 = vpop.permute.xlu1 %151  ;;  %v160_v25 = vpop.permute.xlu0 %159 }
  0x97   :  { %v156_v27 = vpop.permute.xlu1 %155  ;;  %v176_v28 = vpop.permute.xlu0 %175 }
  0x9b   :  { %v565_v30 = vpop.permute.xlu0 %191 }
  0x9c   :  { %v66_v32 = vpop.permute.xlu1 %65 }
  0x9d   :  { %v137_v42 = vmul.f32 %v576_v34, %v66_v32 }
  0xa0   :  { %v51_v35 = vpop.permute.xlu0 %50 }
  0xa1   :  { %v134_v36 = vmul.f32 %v576_v34, %v51_v35  ;;  %v164_v37 = vpop.permute.xlu1 %163 }
  0xa2   :  { %v217_v46 = vadd.f32 %v164_v37, %v137_v42 }
  0xa3   :  { %v214_v39 = vadd.f32 %v152_v24, %v134_v36 }
  0xa4   :  { %v56_v38 = vpop.permute.xlu0 %55  ;;  %v233_v54 = vmax.f32 %v217_v46, 0.0 }
  0xa5   :  { %v135_v40 = vmul.f32 %v576_v34, %v56_v38  ;;  %v230_v45 = vmax.f32 %v214_v39, 0.0 }
  0xa6   :  { %v71_v41 = vpop.permute.xlu1 %70 }
  0xa7   :  { %v215_v43 = vadd.f32 %v156_v27, %v135_v40  ;;  %v138_v52 = vmul.f32 %v576_v34, %v71_v41 }
  0xa8   :  { %v61_v44 = vpop.permute.xlu0 %60 }
  0xa9   :  { %v231_v47 = vmax.f32 %v215_v43, 0.0  ;;  %v136_v48 = vmul.f32 %v576_v34, %v61_v44 }
  0xab   :  { %v216_v49 = vadd.f32 %v160_v25, %v136_v48  ;;  %v168_v50 = vpop.permute.xlu1 %167  ;;  %v422_v51 = vpack.c.bf16 %v231_v47, %v230_v45 }
  0xac   :  { %v76_v53 = vpop.permute.xlu0 %75  ;;  %v218_v57 = vadd.f32 %v168_v50, %v138_v52 }
  0xad   :  { %v232_v55 = vmax.f32 %v216_v49, 0.0  ;;  %v139_v56 = vmul.f32 %v576_v34, %v76_v53  ;;  %423 = vmatpush3.bf16.msra.mxu0 %v422_v51 }
  0xae   :  { %424 = vmatprep.subr.bf16.mxu0 %v508_v10  ;;  %v234_v61 = vmax.f32 %v218_v57, 0.0  ;;  %v246_v57 = vld [vmem:[%s616_s2] sm:$0x3] }
  0xaf   :  { %v172_v58 = vpop.permute.xlu1 %171  ;;  %v425_v59 = vpack.c.bf16 %v233_v54, %v232_v55 }
  0xb0   :  { %v219_v60 = vadd.f32 %v172_v58, %v139_v56  ;;  %v81_v63 = vpop.permute.xlu0 %80 }
  0xb1   :  { %426 = vmatpush3.bf16.msra.mxu0 %v425_v59  ;;  %v140_v1 = vmul.f32 %v576_v34, %v81_v63  ;;  %v328_v59 = vsub.f32 1.0, %v572_v33 }
  0xb2   :  { %v235_v62 = vmax.f32 %v219_v60, 0.0  ;;  %427 = vmatprep.subr.bf16.mxu0 %v508_v10 }
  0xb3   :  { %v220_v3 = vadd.f32 %v176_v28, %v140_v1  ;;  %v337_v60 = vrot.slane %v328_v59, %v567_v31 }
  0xb4   :  { %v428_v0 = vpack.c.bf16 %v235_v62, %v234_v61  ;;  %v86_v2 = vpop.permute.xlu1 %85  ;;  %v96_v12 = vpop.permute.xlu0 %95 }
  0xb5   :  { %v141_v4 = vmul.f32 %v576_v34, %v86_v2  ;;  %v236_v7 = vmax.f32 %v220_v3, 0.0  ;;  %v143_v14 = vmul.f32 %v576_v34, %v96_v12 }
  0xb6   :  { %429 = vmatpush3.bf16.msra.mxu0 %v428_v0 }
  0xb7   :  { %430 = vmatprep.subr.bf16.mxu0 %v508_v10 }
  0xb8   :  { %v101_v19 = vpop.permute.xlu0 %100 }
  0xb9   :  { %v180_v5 = vpop.permute.xlu1 %179  ;;  %v144_v22 = vmul.f32 %v576_v34, %v101_v19 }
  0xba   :  { %v221_v6 = vadd.f32 %v180_v5, %v141_v4 }
  0xbb   :  { %v224_v25 = vadd.f32 %v565_v30, %v144_v22 }
  0xbc   :  { %v237_v8 = vmax.f32 %v221_v6, 0.0  ;;  %v116_v37 = vpop.permute.xlu0 %115 }
  0xbd   :  { %v240_v29 = vmax.f32 %v224_v25, 0.0  ;;  %v147_v40 = vmul.f32 %v576_v34, %v116_v37 }
  0xbe   :  { %v431_v9 = vpack.c.bf16 %v237_v8, %v236_v7  ;;  %v91_v11 = vpop.permute.xlu1 %90 }
  0xbf   :  { %v142_v15 = vmul.f32 %v576_v34, %v91_v11 }
  0xc0   :  { %432 = vmatpush3.bf16.msra.mxu0 %v431_v9  ;;  %v121_v42 = vpop.permute.xlu0 %120 }
  0xc1   :  { %433 = vmatprep.subr.bf16.mxu0 %v508_v10  ;;  %v148_v46 = vmul.f32 %v576_v34, %v121_v42 }
  0xc3   :  { %v184_v13 = vpop.permute.xlu1 %183 }
  0xc4   :  { %v222_v16 = vadd.f32 %v184_v13, %v142_v15 }
  0xc5   :  { %v208_v49 = vpop.permute.xlu0 %207 }
  0xc6   :  { %v238_v20 = vmax.f32 %v222_v16, 0.0  ;;  %v228_v50 = vadd.f32 %v208_v49, %v148_v46 }
  0xc7   :  { %v188_v17 = vpop.permute.xlu1 %187 }
  0xc8   :  { %v223_v18 = vadd.f32 %v188_v17, %v143_v14  ;;  %v244_v54 = vmax.f32 %v228_v50, 0.0 }
  0xc9   :  { %v325_v62 = vpop.permute.xlu0 %324 }
  0xca   :  { %v239_v21 = vmax.f32 %v223_v18, 0.0  ;;  %v327_v4 = vmul.f32 %v325_v62, %v576_v34 }
  0xcc   :  { %v434_v23 = vpack.c.bf16 %v239_v21, %v238_v20  ;;  %v106_v24 = vpop.permute.xlu1 %105 }
  0xcd   :  { %v145_v26 = vmul.f32 %v576_v34, %v106_v24 }
  0xce   :  { %435 = vmatpush3.bf16.msra.mxu0 %v434_v23  ;;  %v354_v9 = vpop.permute.xlu0 %353 }
  0xcf   :  { %436 = vmatprep.subr.bf16.mxu0 %v508_v10 }
  0xd1   :  { %v196_v27 = vpop.permute.xlu1 %195 }
  0xd2   :  { %v225_v28 = vadd.f32 %v196_v27, %v145_v26 }
  0xd4   :  { %v241_v32 = vmax.f32 %v225_v28, 0.0 }
  0xd6   :  { %v437_v35 = vpack.c.bf16 %v241_v32, %v240_v29  ;;  %v111_v36 = vpop.permute.xlu1 %110 }
  0xd7   :  { %v146_v39 = vmul.f32 %v576_v34, %v111_v36 }
  0xd8   :  { %438 = vmatpush3.bf16.msra.mxu0 %v437_v35 }
  0xd9   :  { %439 = vmatprep.subr.bf16.mxu0 %v508_v10 }
  0xdb   :  { %v200_v38 = vpop.permute.xlu1 %199 }
  0xdc   :  { %v226_v41 = vadd.f32 %v200_v38, %v146_v39 }
  0xde   :  { %v242_v44 = vmax.f32 %v226_v41, 0.0 }
  0xdf   :  { %v204_v30 = vpop.permute.xlu1 %203 }
  0xe0   :  { %v227_v43 = vadd.f32 %v204_v30, %v147_v40 }
  0xe2   :  { %v243_v45 = vmax.f32 %v227_v43, 0.0 }
  0xe4   :  { %v440_v47 = vpack.c.bf16 %v243_v45, %v242_v44  ;;  %v126_v48 = vpop.permute.xlu1 %125 }
  0xe5   :  { %v149_v51 = vmul.f32 %v576_v34, %v126_v48 }
  0xe6   :  { %441 = vmatpush3.bf16.msra.mxu0 %v440_v47 }
  0xe7   :  { %442 = vmatprep.subr.bf16.mxu0 %v508_v10  ;;  %v368_v10 = vadd.f32 -1.0, %v572_v33 }
  0xe9   :  { %v212_v52 = vpop.permute.xlu1 %211  ;;  %v347_v2 = vrot.slane %v368_v10, %v567_v31 }
  0xea   :  { %v229_v53 = vadd.f32 %v212_v52, %v149_v51 }
  0xec   :  { %v245_v55 = vmax.f32 %v229_v53, 0.0 }
  0xee   :  { %v443_v56 = vpack.c.bf16 %v245_v55, %v244_v54  ;;  %v251_v58 = vpop.permute.xlu1 %250 }
  0xf0   :  { %444 = vmatpush3.bf16.msra.mxu0 %v443_v56 }
  0xf3   :  { %419 = vmatmul.mubr.f32.vlgmr.msra.gmra.mrb[0].mxu0 %v246_v57  ;;  %v331_v61 = vpop.permute.xlu1 %330 }
  0xf4   :  { %v339_v0 = vmul.f32 %v337_v60, %v331_v61 }
  0xf6   :  { %v340_v6 = vadd.f32 %v339_v0, %v327_v4 }
  0xf8   :  { %v359_v12 = vpop.permute.xlu1 %358 }
 0x1c6   :  { %v319_v63 = vpop.f32.mrb[0].mxu0 }
 0x1c7   :  { %v320_v1 = vadd.f32 %v319_v63, %v251_v58  ;;  %v420_v3 = vpop.f32.mrb[1].mxu0 }
 0x1c9   :  { %v341_v5 = vmul.f32 %v320_v1, %v576_v34 }
 0x1cb   :  { %v349_v7 = vmul.f32 %v347_v2, %v341_v5 }
 0x1cd   :  { %v350_v8 = vadd.f32 %v349_v7, %v340_v6 }
 0x1cf   :  { %v351_v11 = vand.u32 2147483647, %v350_v8 }
 0x1d1   :  { %v356_v13 = vmax.f32 %v354_v9, %v351_v11 }
 0x1d3   :  { %v361_v33 = vmin.f32 %v359_v12, %v356_v13 }
 0x1d5   :  { %362 = vst [vmem:[%s618_s4] sm:$0x3] %v361_v33 }
 0x1d6   :  { %367 = vsyncpa [#allocation3], 1 }

</bundles_post_ra>
